<compile_context>
chip_gen: v7x
topology: tpu7x:2x2x1
jax: 0.10.0
libtpu: 0.0.40
codegen_flags: <defaults>
</compile_context>

<pallas_src>
import functools

import jax
import jax.numpy as jnp
from jax.experimental import pallas as pl
from jax.experimental.pallas import tpu as pltpu


def _adain_kernel(x_ref, w_ref, b_ref, o_ref, *, eps, inv_count):
    # x_ref / o_ref: (row_block, l) tiles.  w_ref / b_ref: (row_block, 1) f32.
    # Pass 1: per-row mean (f32 accumulation).
    mean = jnp.sum(x_ref[...].astype(jnp.float32), axis=-1, keepdims=True) * inv_count
    # Pass 2: per-row biased variance via (x - mean)^2 (no cancellation).
    d = x_ref[...].astype(jnp.float32) - mean
    var = jnp.sum(d * d, axis=-1, keepdims=True) * inv_count
    inv = jax.lax.rsqrt(var + eps)
    scale = inv * w_ref[...]                   # (row_block, 1)
    shift = b_ref[...] - mean * scale          # (row_block, 1)
    # Pass 3: apply.  Re-read the tile so no f32 copy stays live across passes.
    o_ref[...] = (x_ref[...].astype(jnp.float32) * scale + shift).astype(o_ref.dtype)


def _x_block_spec(block, index_map, bufs):
    if bufs > 2:
        try:
            return pl.BlockSpec(block, index_map, pipeline_mode=pl.Buffered(bufs))
        except TypeError:  # older JAX without pipeline_mode: fall back to default
            pass
    return pl.BlockSpec(block, index_map)


def adaptive_instance_norm_2d(x, weight, bias, eps=1e-5):
    """x: (b, c, h, w); weight, bias: (b*c,). Returns (b, c, h, w)."""
    bsz, c, h, w = x.shape
    n = bsz * c
    l = h * w
    assert weight.shape == (n,) and bias.shape == (n,), "weight/bias must be (b*c,)"

    itemsize = jnp.dtype(x.dtype).itemsize
    # Sublane packing: 8 rows/vreg for f32, 16 for bf16, 32 for 8-bit dtypes.
    sublane = max(8, 32 // itemsize)

    # Generation-aware VMEM budget (v7x: 64 MiB per core; v5e/v6e: 128 MiB).
    try:
        vmem_capacity = int(pltpu.get_tpu_info().vmem_capacity_bytes)
    except Exception:
        vmem_capacity = 64 << 20  # conservative fallback (v7x-sized)
    tile_budget = vmem_capacity // 4

    # Per-step VMEM per row ~= 2 buffers x (in + out) tiles + one f32 working
    # row during compute.  VMEM footprint of the last dim is lane-padded even
    # when the logical block uses the exact l.
    lane_pad = ((l + 127) // 128) * 128
    per_row_bytes = 2 * 2 * lane_pad * itemsize + lane_pad * 4
    row_block = max(sublane, (tile_budget // per_row_bytes) // sublane * sublane)

    if n <= sublane:
        # Tiny instance count: use the full first dim (legal block shape), one step.
        row_block = n
    else:
        row_block = min(row_block, (n // sublane) * sublane)   # keep block <= array dim
        if n >= 4 * sublane:
            # Guarantee >= 4 grid steps: pipelining + megacore sharding on v7x.
            row_block = min(row_block, sublane * (n // (4 * sublane)))
        row_block = max(sublane, row_block)
    grid = pl.cdiv(n, row_block)
    # TODO(synk): for extremely large spatial extents where even a single
    # sublane-row tile exceeds the VMEM budget, a second (lane) grid axis with
    # scratch sum/sum_sq accumulators would be needed.

    # v7x-class parts: smaller tiles leave headroom for a 3-deep pipeline.
    x_bufs = 3 if (vmem_capacity <= (80 << 20) and grid >= 3) else 2

    tile_bytes = row_block * lane_pad * itemsize
    vmem_limit = (2 * x_bufs * tile_bytes            # double/triple-buffered in + out
                  + 2 * row_block * lane_pad * 4     # f32 working set during compute
                  + 4 * row_block * 128 * 4          # weight/bias blocks (lane-padded)
                  + (8 << 20))                       # headroom / compiler scratch
    vmem_limit = min(max(vmem_limit, 32 << 20), vmem_capacity * 7 // 8)

    x2 = x.reshape(n, l)
    w2 = weight.astype(jnp.float32).reshape(n, 1)
    b2 = bias.astype(jnp.float32).reshape(n, 1)

    kernel = functools.partial(_adain_kernel, eps=float(eps), inv_count=float(1.0 / l))

    out = pl.pallas_call(
        kernel,
        out_shape=jax.ShapeDtypeStruct((n, l), x.dtype),
        grid_spec=pltpu.PrefetchScalarGridSpec(
            num_scalar_prefetch=0,
            grid=(grid,),
            in_specs=[
                _x_block_spec((row_block, l), lambda i: (i, 0), x_bufs),
                pl.BlockSpec((row_block, 1), lambda i: (i, 0)),   # weight, per-step
                pl.BlockSpec((row_block, 1), lambda i: (i, 0)),   # bias,   per-step
            ],
            out_specs=_x_block_spec((row_block, l), lambda i: (i, 0), x_bufs),
        ),
        compiler_params=pltpu.CompilerParams(
            dimension_semantics=("parallel",),
            vmem_limit_bytes=int(vmem_limit),
        ),
    )(x2, w2, b2)

    # TODO(synk): PyTorch's F.batch_norm(training=True) also updates the
    # running_mean/running_var buffers as a side effect; that state update does
    # not affect the returned output and is not reproduced here.
    return out.reshape(bsz, c, h, w)


def _reference(x, weight, bias, eps=1e-5):
    bsz, c, h, w = x.shape
    xr = x.reshape(bsz * c, h * w).astype(jnp.float32)
    mean = xr.mean(axis=-1, keepdims=True)
    var = ((xr - mean) ** 2).mean(axis=-1, keepdims=True)
    y = (xr - mean) / jnp.sqrt(var + eps) * weight[:, None] + bias[:, None]
    return y.reshape(bsz, c, h, w).astype(x.dtype)


def _run_case(keys, shape, name):
    k_x, k_w, k_b = keys
    b, c, h, w = shape
    x = jax.random.normal(k_x, shape, dtype=jnp.float32)
    weight = jax.random.normal(k_w, (b * c,), dtype=jnp.float32) * 0.5 + 1.0
    bias = jax.random.normal(k_b, (b * c,), dtype=jnp.float32) * 0.1
    out = jax.block_until_ready(adaptive_instance_norm_2d(x, weight, bias, eps=1e-5))
    ref = _reference(x, weight, bias, eps=1e-5)
    assert out.shape == shape, f"{name}: wrong shape"
    assert jnp.allclose(out, ref, atol=1e-4, rtol=1e-4), f"{name}: mismatch vs reference"


if __name__ == "__main__":
    key = jax.random.PRNGKey(0)
    ks = jax.random.split(key, 9)

    # Primary case (module-consistent small shape): num_features = c = 4.
    _run_case(ks[0:3], (2, 4, 16, 16), "primary")
    # Odd spatial size / odd instance count: l % 128 != 0, n < sublane.
    _run_case(ks[3:6], (1, 3, 7, 7), "odd")
    # Larger instance count: multi-step grid (>= 4 steps) + partial boundary rows.
    _run_case(ks[6:9], (3, 7, 8, 8), "boundary")

    print("KERNEL_OK")
</pallas_src>

<mosaic_0001>
module attributes {stable_mosaic.version = 11 : i64} {
  func.func @_adain_kernel(%arg0: i32, %arg1: memref<8x256xf32, #tpu.memory_space<vmem>>, %arg2: memref<8x1xf32, #tpu.memory_space<vmem>>, %arg3: memref<8x1xf32, #tpu.memory_space<vmem>>, %arg4: memref<8x256xf32, #tpu.memory_space<vmem>>) attributes {dimension_semantics = [#tpu.dimension_semantics<parallel>], iteration_bounds = array<i64: 1>, scalar_prefetch = 0 : i64, scratch_operands = 0 : i64, tpu.core_type = #tpu.core_type<tc>, window_params = [{transform_indices = @transform_0, window_bounds = array<i64: 8, 256>}, {transform_indices = @transform_1, window_bounds = array<i64: 8, 1>}, {transform_indices = @transform_2, window_bounds = array<i64: 8, 1>}, {transform_indices = @transform_3, window_bounds = array<i64: 8, 256>}]} {
    %c0 = arith.constant 0 : index
    %c0_0 = arith.constant 0 : index
    %0 = vector.load %arg1[%c0, %c0_0] : memref<8x256xf32, #tpu.memory_space<vmem>>, vector<8x256xf32>
    %cst = arith.constant dense<0.000000e+00> : vector<8xf32>
    %1 = vector.multi_reduction <add>, %0, %cst [1] : vector<8x256xf32> to vector<8xf32>
    %2 = vector.shape_cast %1 : vector<8xf32> to vector<8x1xf32>
    %cst_1 = arith.constant 3.906250e-03 : f32
    %3 = vector.broadcast %cst_1 : f32 to vector<8x1xf32>
    %4 = arith.mulf %2, %3 : vector<8x1xf32>
    %c0_2 = arith.constant 0 : index
    %c0_3 = arith.constant 0 : index
    %5 = vector.load %arg1[%c0_2, %c0_3] : memref<8x256xf32, #tpu.memory_space<vmem>>, vector<8x256xf32>
    %6 = vector.broadcast %4 : vector<8x1xf32> to vector<8x256xf32>
    %7 = arith.subf %5, %6 : vector<8x256xf32>
    %8 = arith.mulf %7, %7 : vector<8x256xf32>
    %cst_4 = arith.constant dense<0.000000e+00> : vector<8xf32>
    %9 = vector.multi_reduction <add>, %8, %cst_4 [1] : vector<8x256xf32> to vector<8xf32>
    %10 = vector.shape_cast %9 : vector<8xf32> to vector<8x1xf32>
    %cst_5 = arith.constant 3.906250e-03 : f32
    %11 = vector.broadcast %cst_5 : f32 to vector<8x1xf32>
    %12 = arith.mulf %10, %11 : vector<8x1xf32>
    %cst_6 = arith.constant 9.99999974E-6 : f32
    %13 = vector.broadcast %cst_6 : f32 to vector<8x1xf32>
    %14 = arith.addf %12, %13 : vector<8x1xf32>
    %15 = math.rsqrt %14 : vector<8x1xf32>
    %c0_7 = arith.constant 0 : index
    %c0_8 = arith.constant 0 : index
    %16 = vector.load %arg2[%c0_7, %c0_8] : memref<8x1xf32, #tpu.memory_space<vmem>>, vector<8x1xf32>
    %17 = arith.mulf %15, %16 : vector<8x1xf32>
    %c0_9 = arith.constant 0 : index
    %c0_10 = arith.constant 0 : index
    %18 = vector.load %arg3[%c0_9, %c0_10] : memref<8x1xf32, #tpu.memory_space<vmem>>, vector<8x1xf32>
    %19 = arith.mulf %4, %17 : vector<8x1xf32>
    %20 = arith.subf %18, %19 : vector<8x1xf32>
    %c0_11 = arith.constant 0 : index
    %c0_12 = arith.constant 0 : index
    %21 = vector.load %arg1[%c0_11, %c0_12] : memref<8x256xf32, #tpu.memory_space<vmem>>, vector<8x256xf32>
    %22 = vector.broadcast %17 : vector<8x1xf32> to vector<8x256xf32>
    %23 = arith.mulf %21, %22 : vector<8x256xf32>
    %24 = vector.broadcast %20 : vector<8x1xf32> to vector<8x256xf32>
    %25 = arith.addf %23, %24 : vector<8x256xf32>
    %c0_13 = arith.constant 0 : index
    %c0_14 = arith.constant 0 : index
    %26 = vector.load %arg4[%c0_13, %c0_14] : memref<8x256xf32, #tpu.memory_space<vmem>>, vector<8x256xf32>
    tpu.vector_store %arg4[%c0_13, %c0_14], %25 {strides = array<i32>} : memref<8x256xf32, #tpu.memory_space<vmem>>, vector<8x256xf32>,
    return
  }
  func.func @transform_0(%arg0: i32) -> (i32, i32) {
    %c0_i32 = arith.constant 0 : i32
    %c0_i32_0 = arith.constant 0 : i32
    return %arg0, %c0_i32 : i32, i32
  }
  func.func @transform_1(%arg0: i32) -> (i32, i32) {
    %c0_i32 = arith.constant 0 : i32
    %c0_i32_0 = arith.constant 0 : i32
    return %arg0, %c0_i32 : i32, i32
  }
  func.func @transform_2(%arg0: i32) -> (i32, i32) {
    %c0_i32 = arith.constant 0 : i32
    %c0_i32_0 = arith.constant 0 : i32
    return %arg0, %c0_i32 : i32, i32
  }
  func.func @transform_3(%arg0: i32) -> (i32, i32) {
    %c0_i32 = arith.constant 0 : i32
    %c0_i32_0 = arith.constant 0 : i32
    return %arg0, %c0_i32 : i32, i32
  }
}

</mosaic_0001>

<bundles_post_ra>
// kernel: tpu_custom_call.1
= control target key start
LH: loop header
LB: loop body
LE: loop exit
PB: predicated region body
PF: predicated region fallthrough
CT: control target
= control target key end

     0   :  { %s142_s0 = inlined_call_operand.vmem [shape: f32[8,256], index: 0, kind: input, shape index: {}]   ;;  %s143_s1 = inlined_call_operand.vmem [shape: f32[8,1], index: 1, kind: input, shape index: {}]   ;;  %s144_s2 = inlined_call_operand.vmem [shape: f32[8,1], index: 2, kind: input, shape index: {}]   ;;  %s145_s3 = inlined_call_operand.hbm [shape: f32[8,256], index: 3, kind: output, shape index: {}]  }
   0x1   :  { %v15_v0 = vld [vmem:[%s142_s0] sm:$0xff]  ;;  %v16_v1 = vld [vmem:[%s142_s0 + $0x8] sm:$0xff] }
   0x2   :  { %8 = vsyncpa [#allocation3], 0  ;;  %v17_v2 = vadd.f32 %v16_v1, %v15_v0  ;;  %v96_v10 = vmov 0   ;;  %v31_v14 = vld [vmem:[%s143_s1] sm:$0xff]  ;;  %s97_s19 = smov [#allocation2]  }
   0x3   :  { %68 = vset.pattern.permute.xlu1 %v96_v10  ;;  %69 = vset.pattern.permute.xlu0 %v96_v10  ;;  %v33_v17 = vld [vmem:[%s144_s2] sm:$0xff]  ;;  %s58_s20 = sshll.u32 %s97_s19, 4  ;;  %s59_s20 = int_to_ptr.vmem [resolvable:$true] %s58_s20 }
   0x4   :  { %18 = vadd.xlane.f32.xlu0 %v17_v2  ;;  %s72_s1 = scalar_lea.vmem %s59_s20, 256  ;;  %p77_p1 = scmp.lt.s32.totalorder %s59_s20, %s59_s20 }
   0x5   :  { %p73_p0 = scmp.ne.s32.totalorder %s59_s20, %s72_s1  ;;  %p78_p2 = scmp.lt.s32.totalorder %s72_s1, %s72_s1 }
   0x7   :  { %p79_p3 = por %p78_p2, %p77_p1 }
   0x9   :  { %p80_p4 = pnand %p79_p3, %p73_p0 }
  0x91   :  { %v19_v3 = vpop.xlane.xlu0 %18 }
  0x92   :  { %v20_v4 = vmul.f32 0.00390625, %v19_v3 }
  0x94   :  { %v21_v5 = vsub.f32 %v15_v0, %v20_v4  ;;  %v22_v6 = vsub.f32 %v16_v1, %v20_v4 }
  0x96   :  { %v23_v7 = vmul.f32 %v21_v5, %v21_v5  ;;  %v24_v8 = vmul.f32 %v22_v6, %v22_v6 }
  0x98   :  { %v25_v9 = vadd.f32 %v24_v8, %v23_v7 }
  0x9a   :  { %26 = vadd.xlane.f32.xlu0 %v25_v9 }
 0x127   :  { %v27_v11 = vpop.xlane.xlu0 %26 }
 0x128   :  { %v28_v12 = vmul.f32 0.00390625, %v27_v11 }
 0x12a   :  { %v29_v13 = vadd.f32 1e-05, %v28_v12 }
 0x12c   :  { %70 = vrsqrt.f32 %v29_v13 }
 0x136   :  { %v71_v15 = vpop.eup %70 }
 0x137   :  { %v32_v16 = vmul.f32 %v71_v15, %v31_v14 }
 0x139   :  { %38 = vperm.xlu1 %68, %v32_v16   ;;  %v34_v18 = vmul.f32 %v32_v16, %v20_v4 }
 0x13b   :  { %v35_v19 = vsub.f32 %v33_v17, %v34_v18 }
 0x13d   :  { %45 = vperm.xlu1 %68, %v35_v19  }
 0x1b8   :  { %v39_v20 = vpop.permute.xlu1 %38 }
 0x1b9   :  { %v41_v21 = vmul.f32 %v39_v20, %v15_v0  ;;  %v42_v22 = vmul.f32 %v39_v20, %v16_v1 }
 0x1bc   :  { %v46_v23 = vpop.permute.xlu1 %45 }
 0x1bd   :  { %v48_v24 = vadd.f32 %v46_v23, %v41_v21  ;;  %v49_v25 = vadd.f32 %v46_v23, %v42_v22 }
 0x1bf   :  { %50 = vst [vmem:[#allocation2] sm:$0xff] %v48_v24  ;;  %51 = vst [vmem:[#allocation2 + $0x8] sm:$0xff] %v49_v25 }
 0x1c0   :  { %83 = shalt.err (!%p80_p4)
}
 0x1c1   :  { %s84_s22 = scalar_lea.hbm %s145_s3, 256 }
 0x1c2   :  { %p85_p5 = scmp.ne.s32.totalorder %s145_s3, %s84_s22  ;;  %p88_p6 = scmp.lt.u32.totalorder %s84_s22, %s145_s3 }
 0x1c4   :  { %p90_p7 = pnand %p88_p6, %p85_p5 }
 0x1c6   :  { %93 = shalt.err (!%p90_p7)
}
 0x1c7   :  { %61 = dma.vmem_to_hbm [thread:$0]  %s59_s20, 256, %s145_s3, [#allocation3]  }
 0x1c8   :  { %94 = dma.done.wait [#allocation3], 256  }
 0x1c9   :  { %95 = vsyncadd [#allocation3], 4294967040 }
 0x1ca   :  { %65 = vsyncpa [#allocation3], 1 }

</bundles_post_ra>
